<compile_context>
chip_gen: v7x
topology: tpu7x:2x2x1
jax: 0.10.0
libtpu: 0.0.40
codegen_flags: <defaults>
</compile_context>

<pallas_src>
import functools

import jax
import jax.numpy as jnp
from jax.experimental import pallas as pl
from jax.experimental.pallas import tpu as pltpu


_NUM_CORE_SPLITS = 2   # v7x has 2 TensorCores; on 1-core chips this is just one
                       # extra (tiny) sequential outer iteration.


def _multiloss_kernel(margin_ref, pos_ref, neg_ref, flag_ref,
                      ll_ref, lo_ref, rl_ref, ro_ref, out_ref, acc_ref,
                      *, batch, block_b, blocks_per_core, ragged):
    step = pl.program_id(1)

    @pl.when(step == 0)
    def _init():
        acc_ref[0] = 0.0          # raw contrastive-pair partial sum
        acc_ref[1] = 0.0          # raw (left + right) soft-CE partial sum

    if ragged:
        # Only the (possibly duplicated / ragged) padding rows need masking;
        # emit this code only when padding can exist at all.
        base = (pl.program_id(0) * blocks_per_core + step) * block_b
        row_ids = base + jax.lax.broadcasted_iota(jnp.int32, (block_b, 1), 0)
        mask = row_ids < batch

        def mask_rows(x):
            # Must stay a select (not a multiply): padded VMEM rows can hold
            # NaN/Inf garbage and multiply-by-zero would propagate it.
            return jnp.where(mask, x, 0.0)
    else:
        def mask_rows(x):
            return x

    f32 = jnp.float32

    # ---- contrastive-pair partial sum -------------------------------------
    pos = pos_ref[...].astype(f32)
    neg = neg_ref[...].astype(f32)
    flag = flag_ref[...].astype(f32)
    diff = pos - neg
    distance = jnp.sum(diff * diff, axis=1, keepdims=True)     # (block_b, 1)
    hinge = jnp.maximum(margin_ref[0] - distance, 0.0)         # relu(-d + margin)
    pair_rows = flag * distance + (1.0 - flag) * hinge
    acc_ref[0] += jnp.sum(mask_rows(pair_rows))

    # ---- soft-target cross-entropy, left and right computed separately ----
    def soft_ce_partial(logits_ref, targets_ref):
        logits = logits_ref[...].astype(f32)
        targets = targets_ref[...].astype(f32)
        m = jnp.max(logits, axis=1, keepdims=True)
        lse = m + jnp.log(jnp.sum(jnp.exp(logits - m), axis=1, keepdims=True))
        per_row = jnp.sum(targets * (lse - logits), axis=1, keepdims=True)
        return jnp.sum(mask_rows(per_row))

    acc_ref[1] += soft_ce_partial(ll_ref, lo_ref) + soft_ce_partial(rl_ref, ro_ref)

    # ---- finalize: scale raw partials once, write this core's partial ------
    @pl.when(step == pl.num_programs(1) - 1)
    def _finalize():
        inv_b = 1.0 / float(batch)
        total = (0.7 * acc_ref[0] + 0.15 * acc_ref[1]) * inv_b
        out_ref[...] = jnp.broadcast_to(total, out_ref.shape).astype(out_ref.dtype)


def _vmem_limit_bytes():
    """Per-generation VMEM limit (~60% of physical, clamped to [32, 100] MiB)."""
    try:
        cap = int(pltpu.get_tpu_info().vmem_capacity_bytes)
    except Exception:
        cap = 128 << 20
    return max(32 << 20, min(int(cap * 0.6), 100 << 20))


def _choose_block_b(batch, per_row_bytes, budget_bytes):
    cap = (budget_bytes // max(per_row_bytes, 1)) // 8 * 8
    cap = max(8, min(cap, 4096))
    return batch if batch <= cap else cap


def multi_loss(positive, negative, flag, left_logits, left_one_hot,
               right_logits, right_one_hot, *, margin, block_b=None):
    """Pallas implementation of MultiLoss.forward (size_average=True)."""
    batch, dim = positive.shape
    n_classes = left_logits.shape[-1]

    vmem_limit = _vmem_limit_bytes()

    if block_b is None:
        # Double-buffered native-dtype input tiles + in-kernel f32 working set.
        in_bytes_per_row = 2 * (
            dim * (positive.dtype.itemsize + negative.dtype.itemsize)
            + flag.dtype.itemsize
            + n_classes * (left_logits.dtype.itemsize + left_one_hot.dtype.itemsize
                           + right_logits.dtype.itemsize + right_one_hot.dtype.itemsize))
        f32_bytes_per_row = 4 * (3 * dim + 4 * n_classes)
        block_b = _choose_block_b(batch, in_bytes_per_row + f32_bytes_per_row,
                                  int(vmem_limit * 0.85))
    if block_b >= batch:
        block_b = batch                       # full-extent block, any B allowed
    else:
        block_b = max(8, (block_b // 8) * 8)  # sublane (8, _) divisibility rule

    num_blocks = pl.cdiv(batch, block_b)
    blocks_per_core = pl.cdiv(num_blocks, _NUM_CORE_SPLITS)
    # Padding rows exist iff the (core-split, block-tiled) coverage exceeds B.
    ragged = (_NUM_CORE_SPLITS * blocks_per_core * block_b != batch)

    flag2d = flag.reshape(batch, 1)
    margin_arr = jnp.asarray([margin], dtype=jnp.float32)

    def row_spec(last_dim):
        # Clamp out-of-range block indices (odd block counts / duplicate last
        # block on the second core-split); their rows are masked in-kernel.
        return pl.BlockSpec(
            (block_b, last_dim),
            lambda c, i: (jnp.minimum(c * blocks_per_core + i, num_blocks - 1), 0))

    kernel = functools.partial(_multiloss_kernel, batch=batch, block_b=block_b,
                               blocks_per_core=blocks_per_core, ragged=ragged)
    out = pl.pallas_call(
        kernel,
        out_shape=jax.ShapeDtypeStruct((_NUM_CORE_SPLITS, 8, 128), jnp.float32),
        grid=(_NUM_CORE_SPLITS, blocks_per_core),
        in_specs=[
            pl.BlockSpec(memory_space=pltpu.MemorySpace.SMEM),  # margin scalar
            row_spec(dim),                                       # positive
            row_spec(dim),                                       # negative
            row_spec(1),                                         # flag
            row_spec(n_classes),                                 # left_logits
            row_spec(n_classes),                                 # left_one_hot
            row_spec(n_classes),                                 # right_logits
            row_spec(n_classes),                                 # right_one_hot
        ],
        out_specs=pl.BlockSpec((1, 8, 128), lambda c, i: (c, 0, 0)),
        scratch_shapes=[pltpu.SMEM((2,), jnp.float32)],
        compiler_params=pltpu.CompilerParams(
            dimension_semantics=("parallel", "arbitrary"),
            vmem_limit_bytes=vmem_limit),
    )(margin_arr, positive, negative, flag2d,
      left_logits, left_one_hot, right_logits, right_one_hot)
    return jnp.sum(out[:, 0, 0])


def multi_loss_ref(positive, negative, flag, left_logits, left_one_hot,
                   right_logits, right_one_hot, *, margin):
    """Pure-JAX reference mirroring the PyTorch forward (computed in f32)."""
    f32 = jnp.float32
    positive, negative = positive.astype(f32), negative.astype(f32)
    flag = flag.astype(f32)
    distance = jnp.sum((positive - negative) ** 2, axis=1)
    losses = flag * distance + (1.0 - flag) * jax.nn.relu(-distance + margin)

    def ce(logits, targets):
        logp = jax.nn.log_softmax(logits.astype(f32), axis=1)
        return jnp.mean(-jnp.sum(targets.astype(f32) * logp, axis=1))

    return (0.7 * jnp.mean(losses)
            + 0.15 * ce(left_logits, left_one_hot)
            + 0.15 * ce(right_logits, right_one_hot))


def _make_inputs(key, batch, dim, n_classes, emb_dtype):
    k_pos, k_neg, k_flag, k_ll, k_lc, k_rl, k_rc = jax.random.split(key, 7)
    positive = jax.random.normal(k_pos, (batch, dim)).astype(emb_dtype)
    negative = jax.random.normal(k_neg, (batch, dim)).astype(emb_dtype)
    flag = jax.random.bernoulli(k_flag, 0.5, (batch,)).astype(jnp.float32)
    left_logits = jax.random.normal(k_ll, (batch, n_classes)).astype(emb_dtype)
    left_one_hot = jax.nn.one_hot(
        jax.random.randint(k_lc, (batch,), 0, n_classes), n_classes,
        dtype=emb_dtype)
    right_logits = jax.random.normal(k_rl, (batch, n_classes)).astype(emb_dtype)
    right_one_hot = jax.nn.one_hot(
        jax.random.randint(k_rc, (batch,), 0, n_classes), n_classes,
        dtype=emb_dtype)
    return (positive, negative, flag, left_logits, left_one_hot,
            right_logits, right_one_hot)


if __name__ == "__main__":
    key = jax.random.PRNGKey(0)
    k1, k2 = jax.random.split(key)

    # --- test 1: small f32, single block (second core-split fully masked) ---
    margin = 1.0
    args1 = _make_inputs(k1, batch=8, dim=32, n_classes=8,
                         emb_dtype=jnp.float32)
    out1 = jax.block_until_ready(multi_loss(*args1, margin=margin))
    ref1 = multi_loss_ref(*args1, margin=margin)
    assert jnp.allclose(out1, ref1, rtol=1e-5, atol=1e-5), (out1, ref1)

    # --- test 2: bf16 inputs, multi-step grid with ragged last block --------
    margin2 = 0.75
    args2 = _make_inputs(k2, batch=200, dim=32, n_classes=8,
                         emb_dtype=jnp.bfloat16)
    out2 = jax.block_until_ready(
        multi_loss(*args2, margin=margin2, block_b=64))   # 200 % 64 != 0
    ref2 = multi_loss_ref(*args2, margin=margin2)
    assert jnp.allclose(out2, ref2, rtol=1e-4, atol=1e-4), (out2, ref2)

    print("KERNEL_OK")
</pallas_src>

<mosaic_0001>
module attributes {stable_mosaic.version = 11 : i64} {
  func.func @_multiloss_kernel(%arg0: i32, %arg1: i32, %arg2: memref<1xf32, #tpu.memory_space<smem>>, %arg3: memref<8x32xf32, #tpu.memory_space<vmem>>, %arg4: memref<8x32xf32, #tpu.memory_space<vmem>>, %arg5: memref<8x1xf32, #tpu.memory_space<vmem>>, %arg6: memref<8x8xf32, #tpu.memory_space<vmem>>, %arg7: memref<8x8xf32, #tpu.memory_space<vmem>>, %arg8: memref<8x8xf32, #tpu.memory_space<vmem>>, %arg9: memref<8x8xf32, #tpu.memory_space<vmem>>, %arg10: memref<1x8x128xf32, #tpu.memory_space<vmem>>, %arg11: memref<2xf32, #tpu.memory_space<smem>>) attributes {dimension_semantics = [#tpu.dimension_semantics<parallel>, #tpu.dimension_semantics<arbitrary>], iteration_bounds = array<i64: 2, 1>, scalar_prefetch = 0 : i64, scratch_operands = 1 : i64, tpu.core_type = #tpu.core_type<tc>, window_params = [{transform_indices = @transform_0, window_bounds = array<i64: 1>}, {transform_indices = @transform_1, window_bounds = array<i64: 8, 32>}, {transform_indices = @transform_2, window_bounds = array<i64: 8, 32>}, {transform_indices = @transform_3, window_bounds = array<i64: 8, 1>}, {transform_indices = @transform_4, window_bounds = array<i64: 8, 8>}, {transform_indices = @transform_5, window_bounds = array<i64: 8, 8>}, {transform_indices = @transform_6, window_bounds = array<i64: 8, 8>}, {transform_indices = @transform_7, window_bounds = array<i64: 8, 8>}, {transform_indices = @transform_8, window_bounds = array<i64: 1, 8, 128>}]} {
    %c0_i32 = arith.constant 0 : i32
    %0 = arith.cmpi eq, %arg1, %c0_i32 : i32
    %1 = arith.extui %0 : i1 to i32
    %c0_i32_0 = arith.constant 0 : i32
    %2 = arith.cmpi ne, %1, %c0_i32_0 : i32
    scf.if %2 {
      %cst_35 = arith.constant 0.000000e+00 : f32
      %c0_36 = arith.constant 0 : index
      %88 = memref.load %arg11[%c0_36] : memref<2xf32, #tpu.memory_space<smem>>
      memref.store %cst_35, %arg11[%c0_36] : memref<2xf32, #tpu.memory_space<smem>>
      %cst_37 = arith.constant 0.000000e+00 : f32
      %c1_38 = arith.constant 1 : index
      %89 = memref.load %arg11[%c1_38] : memref<2xf32, #tpu.memory_space<smem>>
      memref.store %cst_37, %arg11[%c1_38] : memref<2xf32, #tpu.memory_space<smem>>
    } else {
    }
    %c1_i32 = arith.constant 1 : i32
    %3 = arith.muli %arg0, %c1_i32 : i32
    %4 = arith.addi %3, %arg1 : i32
    %c8_i32 = arith.constant 8 : i32
    %5 = arith.muli %4, %c8_i32 : i32
    %6 = tpu.iota {dimensions = array<i32: 0>} : vector<8x1xi32>
    %7 = vector.broadcast %5 : i32 to vector<8x1xi32>
    %8 = arith.addi %7, %6 : vector<8x1xi32>
    %c8_i32_1 = arith.constant 8 : i32
    %9 = vector.broadcast %c8_i32_1 : i32 to vector<8x1xi32>
    %10 = arith.cmpi slt, %8, %9 : vector<8x1xi32>
    %c0 = arith.constant 0 : index
    %c0_2 = arith.constant 0 : index
    %11 = vector.load %arg3[%c0, %c0_2] : memref<8x32xf32, #tpu.memory_space<vmem>>, vector<8x32xf32>
    %c0_3 = arith.constant 0 : index
    %c0_4 = arith.constant 0 : index
    %12 = vector.load %arg4[%c0_3, %c0_4] : memref<8x32xf32, #tpu.memory_space<vmem>>, vector<8x32xf32>
    %c0_5 = arith.constant 0 : index
    %c0_6 = arith.constant 0 : index
    %13 = vector.load %arg5[%c0_5, %c0_6] : memref<8x1xf32, #tpu.memory_space<vmem>>, vector<8x1xf32>
    %14 = arith.subf %11, %12 : vector<8x32xf32>
    %15 = arith.mulf %14, %14 : vector<8x32xf32>
    %cst = arith.constant dense<0.000000e+00> : vector<8xf32>
    %16 = vector.multi_reduction <add>, %15, %cst [1] : vector<8x32xf32> to vector<8xf32>
    %17 = vector.shape_cast %16 : vector<8xf32> to vector<8x1xf32>
    %c0_7 = arith.constant 0 : index
    %18 = memref.load %arg2[%c0_7] : memref<1xf32, #tpu.memory_space<smem>>
    %19 = vector.broadcast %18 : f32 to vector<8x1xf32>
    %20 = arith.subf %19, %17 : vector<8x1xf32>
    %cst_8 = arith.constant 0.000000e+00 : f32
    %21 = vector.broadcast %cst_8 : f32 to vector<8x1xf32>
    %22 = arith.maximumf %20, %21 : vector<8x1xf32>
    %23 = arith.mulf %13, %17 : vector<8x1xf32>
    %cst_9 = arith.constant 1.000000e+00 : f32
    %24 = vector.broadcast %cst_9 : f32 to vector<8x1xf32>
    %25 = arith.subf %24, %13 : vector<8x1xf32>
    %26 = arith.mulf %25, %22 : vector<8x1xf32>
    %27 = arith.addf %23, %26 : vector<8x1xf32>
    %c0_10 = arith.constant 0 : index
    %28 = memref.load %arg11[%c0_10] : memref<2xf32, #tpu.memory_space<smem>>
    %cst_11 = arith.constant 0.000000e+00 : f32
    %29 = vector.broadcast %cst_11 : f32 to vector<8x1xf32>
    %30 = arith.select %10, %27, %29 : vector<8x1xi1>, vector<8x1xf32>
    %31 = vector.shape_cast %30 : vector<8x1xf32> to vector<1x8x1xf32>
    %cst_12 = arith.constant dense<0.000000e+00> : vector<1xf32>
    %32 = vector.multi_reduction <add>, %31, %cst_12 [1, 2] : vector<1x8x1xf32> to vector<1xf32>
    %33 = vector.shape_cast %32 : vector<1xf32> to vector<1x1x1xf32>
    %34 = vector.extract %33[0, 0, 0] : f32 from vector<1x1x1xf32>
    %35 = arith.addf %28, %34 : f32
    %c0_13 = arith.constant 0 : index
    %36 = memref.load %arg11[%c0_13] : memref<2xf32, #tpu.memory_space<smem>>
    memref.store %35, %arg11[%c0_13] : memref<2xf32, #tpu.memory_space<smem>>
    %c1 = arith.constant 1 : index
    %37 = memref.load %arg11[%c1] : memref<2xf32, #tpu.memory_space<smem>>
    %c0_14 = arith.constant 0 : index
    %c0_15 = arith.constant 0 : index
    %38 = vector.load %arg6[%c0_14, %c0_15] : memref<8x8xf32, #tpu.memory_space<vmem>>, vector<8x8xf32>
    %c0_16 = arith.constant 0 : index
    %c0_17 = arith.constant 0 : index
    %39 = vector.load %arg7[%c0_16, %c0_17] : memref<8x8xf32, #tpu.memory_space<vmem>>, vector<8x8xf32>
    %cst_18 = arith.constant dense<0xFF800000> : vector<8xf32>
    %40 = vector.multi_reduction <maximumf>, %38, %cst_18 [1] : vector<8x8xf32> to vector<8xf32>
    %41 = vector.shape_cast %40 : vector<8xf32> to vector<8x1xf32>
    %42 = vector.broadcast %41 : vector<8x1xf32> to vector<8x8xf32>
    %43 = arith.subf %38, %42 : vector<8x8xf32>
    %44 = math.exp %43 : vector<8x8xf32>
    %cst_19 = arith.constant dense<0.000000e+00> : vector<8xf32>
    %45 = vector.multi_reduction <add>, %44, %cst_19 [1] : vector<8x8xf32> to vector<8xf32>
    %46 = vector.shape_cast %45 : vector<8xf32> to vector<8x1xf32>
    %47 = math.log %46 : vector<8x1xf32>
    %48 = arith.addf %41, %47 : vector<8x1xf32>
    %49 = vector.broadcast %48 : vector<8x1xf32> to vector<8x8xf32>
    %50 = arith.subf %49, %38 : vector<8x8xf32>
    %51 = arith.mulf %39, %50 : vector<8x8xf32>
    %cst_20 = arith.constant dense<0.000000e+00> : vector<8xf32>
    %52 = vector.multi_reduction <add>, %51, %cst_20 [1] : vector<8x8xf32> to vector<8xf32>
    %53 = vector.shape_cast %52 : vector<8xf32> to vector<8x1xf32>
    %cst_21 = arith.constant 0.000000e+00 : f32
    %54 = vector.broadcast %cst_21 : f32 to vector<8x1xf32>
    %55 = arith.select %10, %53, %54 : vector<8x1xi1>, vector<8x1xf32>
    %56 = vector.shape_cast %55 : vector<8x1xf32> to vector<1x8x1xf32>
    %cst_22 = arith.constant dense<0.000000e+00> : vector<1xf32>
    %57 = vector.multi_reduction <add>, %56, %cst_22 [1, 2] : vector<1x8x1xf32> to vector<1xf32>
    %58 = vector.shape_cast %57 : vector<1xf32> to vector<1x1x1xf32>
    %59 = vector.extract %58[0, 0, 0] : f32 from vector<1x1x1xf32>
    %c0_23 = arith.constant 0 : index
    %c0_24 = arith.constant 0 : index
    %60 = vector.load %arg8[%c0_23, %c0_24] : memref<8x8xf32, #tpu.memory_space<vmem>>, vector<8x8xf32>
    %c0_25 = arith.constant 0 : index
    %c0_26 = arith.constant 0 : index
    %61 = vector.load %arg9[%c0_25, %c0_26] : memref<8x8xf32, #tpu.memory_space<vmem>>, vector<8x8xf32>
    %cst_27 = arith.constant dense<0xFF800000> : vector<8xf32>
    %62 = vector.multi_reduction <maximumf>, %60, %cst_27 [1] : vector<8x8xf32> to vector<8xf32>
    %63 = vector.shape_cast %62 : vector<8xf32> to vector<8x1xf32>
    %64 = vector.broadcast %63 : vector<8x1xf32> to vector<8x8xf32>
    %65 = arith.subf %60, %64 : vector<8x8xf32>
    %66 = math.exp %65 : vector<8x8xf32>
    %cst_28 = arith.constant dense<0.000000e+00> : vector<8xf32>
    %67 = vector.multi_reduction <add>, %66, %cst_28 [1] : vector<8x8xf32> to vector<8xf32>
    %68 = vector.shape_cast %67 : vector<8xf32> to vector<8x1xf32>
    %69 = math.log %68 : vector<8x1xf32>
    %70 = arith.addf %63, %69 : vector<8x1xf32>
    %71 = vector.broadcast %70 : vector<8x1xf32> to vector<8x8xf32>
    %72 = arith.subf %71, %60 : vector<8x8xf32>
    %73 = arith.mulf %61, %72 : vector<8x8xf32>
    %cst_29 = arith.constant dense<0.000000e+00> : vector<8xf32>
    %74 = vector.multi_reduction <add>, %73, %cst_29 [1] : vector<8x8xf32> to vector<8xf32>
    %75 = vector.shape_cast %74 : vector<8xf32> to vector<8x1xf32>
    %cst_30 = arith.constant 0.000000e+00 : f32
    %76 = vector.broadcast %cst_30 : f32 to vector<8x1xf32>
    %77 = arith.select %10, %75, %76 : vector<8x1xi1>, vector<8x1xf32>
    %78 = vector.shape_cast %77 : vector<8x1xf32> to vector<1x8x1xf32>
    %cst_31 = arith.constant dense<0.000000e+00> : vector<1xf32>
    %79 = vector.multi_reduction <add>, %78, %cst_31 [1, 2] : vector<1x8x1xf32> to vector<1xf32>
    %80 = vector.shape_cast %79 : vector<1xf32> to vector<1x1x1xf32>
    %81 = vector.extract %80[0, 0, 0] : f32 from vector<1x1x1xf32>
    %82 = arith.addf %59, %81 : f32
    %83 = arith.addf %37, %82 : f32
    %c1_32 = arith.constant 1 : index
    %84 = memref.load %arg11[%c1_32] : memref<2xf32, #tpu.memory_space<smem>>
    memref.store %83, %arg11[%c1_32] : memref<2xf32, #tpu.memory_space<smem>>
    %c0_i32_33 = arith.constant 0 : i32
    %85 = arith.cmpi eq, %arg1, %c0_i32_33 : i32
    %86 = arith.extui %85 : i1 to i32
    %c0_i32_34 = arith.constant 0 : i32
    %87 = arith.cmpi ne, %86, %c0_i32_34 : i32
    scf.if %87 {
      %c0_35 = arith.constant 0 : index
      %88 = memref.load %arg11[%c0_35] : memref<2xf32, #tpu.memory_space<smem>>
      %cst_36 = arith.constant 0.699999988 : f32
      %89 = arith.mulf %cst_36, %88 : f32
      %c1_37 = arith.constant 1 : index
      %90 = memref.load %arg11[%c1_37] : memref<2xf32, #tpu.memory_space<smem>>
      %cst_38 = arith.constant 1.500000e-01 : f32
      %91 = arith.mulf %cst_38, %90 : f32
      %92 = arith.addf %89, %91 : f32
      %cst_39 = arith.constant 1.250000e-01 : f32
      %93 = arith.mulf %92, %cst_39 : f32
      %94 = vector.broadcast %93 : f32 to vector<1x8x128xf32>
      %c0_40 = arith.constant 0 : index
      %c0_41 = arith.constant 0 : index
      %c0_42 = arith.constant 0 : index
      %95 = vector.load %arg10[%c0_40, %c0_41, %c0_42] : memref<1x8x128xf32, #tpu.memory_space<vmem>>, vector<1x8x128xf32>
      tpu.vector_store %arg10[%c0_40, %c0_41, %c0_42], %94 {strides = array<i32>} : memref<1x8x128xf32, #tpu.memory_space<vmem>>, vector<1x8x128xf32>,
    } else {
    }
    return
  }
  func.func @transform_0(%arg0: i32, %arg1: i32) -> i32 {
    %c0_i32 = arith.constant 0 : i32
    %c0_i32_0 = arith.constant 0 : i32
    return %c0_i32 : i32
  }
  func.func @transform_1(%arg0: i32, %arg1: i32) -> (i32, i32) {
    %c1_i32 = arith.constant 1 : i32
    %0 = arith.muli %arg0, %c1_i32 : i32
    %1 = arith.addi %0, %arg1 : i32
    %c0_i32 = arith.constant 0 : i32
    %2 = arith.minsi %1, %c0_i32 : i32
    %c0_i32_0 = arith.constant 0 : i32
    %c0_i32_1 = arith.constant 0 : i32
    return %2, %c0_i32_0 : i32, i32
  }
  func.func @transform_2(%arg0: i32, %arg1: i32) -> (i32, i32) {
    %c1_i32 = arith.constant 1 : i32
    %0 = arith.muli %arg0, %c1_i32 : i32
    %1 = arith.addi %0, %arg1 : i32
    %c0_i32 = arith.constant 0 : i32
    %2 = arith.minsi %1, %c0_i32 : i32
    %c0_i32_0 = arith.constant 0 : i32
    %c0_i32_1 = arith.constant 0 : i32
    return %2, %c0_i32_0 : i32, i32
  }
  func.func @transform_3(%arg0: i32, %arg1: i32) -> (i32, i32) {
    %c1_i32 = arith.constant 1 : i32
    %0 = arith.muli %arg0, %c1_i32 : i32
    %1 = arith.addi %0, %arg1 : i32
    %c0_i32 = arith.constant 0 : i32
    %2 = arith.minsi %1, %c0_i32 : i32
    %c0_i32_0 = arith.constant 0 : i32
    %c0_i32_1 = arith.constant 0 : i32
    return %2, %c0_i32_0 : i32, i32
  }
  func.func @transform_4(%arg0: i32, %arg1: i32) -> (i32, i32) {
    %c1_i32 = arith.constant 1 : i32
    %0 = arith.muli %arg0, %c1_i32 : i32
    %1 = arith.addi %0, %arg1 : i32
    %c0_i32 = arith.constant 0 : i32
    %2 = arith.minsi %1, %c0_i32 : i32
    %c0_i32_0 = arith.constant 0 : i32
    %c0_i32_1 = arith.constant 0 : i32
    return %2, %c0_i32_0 : i32, i32
  }
  func.func @transform_5(%arg0: i32, %arg1: i32) -> (i32, i32) {
    %c1_i32 = arith.constant 1 : i32
    %0 = arith.muli %arg0, %c1_i32 : i32
    %1 = arith.addi %0, %arg1 : i32
    %c0_i32 = arith.constant 0 : i32
    %2 = arith.minsi %1, %c0_i32 : i32
    %c0_i32_0 = arith.constant 0 : i32
    %c0_i32_1 = arith.constant 0 : i32
    return %2, %c0_i32_0 : i32, i32
  }
  func.func @transform_6(%arg0: i32, %arg1: i32) -> (i32, i32) {
    %c1_i32 = arith.constant 1 : i32
    %0 = arith.muli %arg0, %c1_i32 : i32
    %1 = arith.addi %0, %arg1 : i32
    %c0_i32 = arith.constant 0 : i32
    %2 = arith.minsi %1, %c0_i32 : i32
    %c0_i32_0 = arith.constant 0 : i32
    %c0_i32_1 = arith.constant 0 : i32
    return %2, %c0_i32_0 : i32, i32
  }
  func.func @transform_7(%arg0: i32, %arg1: i32) -> (i32, i32) {
    %c1_i32 = arith.constant 1 : i32
    %0 = arith.muli %arg0, %c1_i32 : i32
    %1 = arith.addi %0, %arg1 : i32
    %c0_i32 = arith.constant 0 : i32
    %2 = arith.minsi %1, %c0_i32 : i32
    %c0_i32_0 = arith.constant 0 : i32
    %c0_i32_1 = arith.constant 0 : i32
    return %2, %c0_i32_0 : i32, i32
  }
  func.func @transform_8(%arg0: i32, %arg1: i32) -> (i32, i32, i32) {
    %c0_i32 = arith.constant 0 : i32
    %c0_i32_0 = arith.constant 0 : i32
    %c0_i32_1 = arith.constant 0 : i32
    return %arg0, %c0_i32, %c0_i32_0 : i32, i32, i32
  }
}

</mosaic_0001>

<bundles_post_ra>
// kernel: tpu_custom_call.1
= control target key start
LH: loop header
LB: loop body
LE: loop exit
PB: predicated region body
PF: predicated region fallthrough
CT: control target
= control target key end

     0   :  { %s1868_s0 = inlined_call_operand.<no memory space> [shape: f32[1], index: 0, kind: input, shape index: {}]   ;;  %s1869_s1 = inlined_call_operand.hbm [shape: f32[8,32], index: 1, kind: input, shape index: {}]   ;;  %s1870_s2 = inlined_call_operand.hbm [shape: f32[8,32], index: 2, kind: input, shape index: {}]   ;;  %s1871_s3 = inlined_call_operand.hbm [shape: f32[8,1], index: 3, kind: input, shape index: {}]   ;;  %s1872_s4 = inlined_call_operand.hbm [shape: f32[8,8], index: 4, kind: input, shape index: {}]   ;;  %s1873_s5 = inlined_call_operand.hbm [shape: f32[8,8], index: 5, kind: input, shape index: {}]   ;;  %s1874_s6 = inlined_call_operand.hbm [shape: f32[8,8], index: 6, kind: input, shape index: {}]   ;;  %s1875_s7 = inlined_call_operand.hbm [shape: f32[8,8], index: 7, kind: input, shape index: {}]   ;;  %s1876_s8 = inlined_call_operand.hbm [shape: f32[2,8,128], index: 8, kind: output, shape index: {}]  }
   0x1   :  { %1888 = sst [smem:[#allocation27_spill]] %s1870_s2 }
   0x2   :  { %1889 = sst [smem:[#allocation28_spill]] %s1872_s4 }
   0x3   :  { %13 = sst [smem:[#allocation3]] %s1868_s0 }
   0x4   :  { %14 = vsyncpa [#allocation5], 0 }
   0x5   :  { %16 = vsyncpa [#allocation5 + $0x1], 0 }
   0x6   :  { %17 = vsyncpa [#allocation8], 0 }
   0x7   :  { %19 = vsyncpa [#allocation8 + $0x1], 0 }
   0x8   :  { %20 = vsyncpa [#allocation11], 0 }
   0x9   :  { %22 = vsyncpa [#allocation11 + $0x1], 0 }
   0xa   :  { %23 = vsyncpa [#allocation14], 0 }
   0xb   :  { %25 = vsyncpa [#allocation14 + $0x1], 0 }
   0xc   :  { %26 = vsyncpa [#allocation6], 0 }
   0xd   :  { %28 = vsyncpa [#allocation6 + $0x1], 0  ;;  %s1524_s29 = smov 0   ;;  %s1526_s30 = smov 0  }
   0xe   :  { %s1528_s9 = smov 0   ;;  %s1530_s10 = smov 0  }
   0xf   :  { %s1532_s11 = smov 0   ;;  %s1534_s0 = smov 0  }
  0x10   :  { %s1536_s12 = smov 0   ;;  %s1538_s13 = smov 0  }
  0x11 LB: > { %1890 = sst [smem:[#allocation22_spill]] %s1446_s9  ;;  %s1563_s14 = sadd.s32 4294967295, %s1466_s13   ;;  %s1466_s13 = sphi %s1538_s13, %s34_s13   ;;  %s1462_s12 = sphi %s1536_s12, %s1925_s12   ;;  %s1458_s0 = sphi %s1534_s0, %s1924_s0   ;;  %s1454_s11 = sphi %s1532_s11, %s1858_s11   ;;  %s1450_s10 = sphi %s1530_s10, %s1928_s10   ;;  %s1446_s9 = sphi %s1528_s9, %s1923_s9   ;;  %s1442_s30 = sphi %s1526_s30, %s1927_s30   ;;  %s1438_s29 = sphi %s1524_s29, %s1926_s29  }
  0x12   : > { %1891 = sst [smem:[#allocation23_spill]] %s1462_s12  ;;  %s978_s15 = sadd.s32 4294967294, %s1466_s13  }
  0x13   : > { %1892 = sst [smem:[#allocation24_spill]] %s1466_s13  ;;  %s46_s16 = sadd.s32 1, %s1462_s12 }
  0x14   : > { %p48_p0 = scmp.ge.s32.totalorder %s46_s16, 2  ;;  %p1435_p1 = scmp.ne.s32.totalorder %s1454_s11, 0 }
  0x15   : > { %p88_p2 = scmp.eq.s32.totalorder %s1466_s13, 0  ;;  %p93_p3 = scmp.ne.s32.totalorder %s1454_s11, %s1450_s10 }
  0x16   : > { %s1930_s16 = smov (%p48_p0, %s46_s16), 0  ;;  %p94_p5 = scmp.eq.s32.totalorder %s1563_s14, 0 }
  0x17   : > { %1893 = sst [smem:[#allocation25_spill]] %s1930_s16  ;;  %p1572_p4 = por %p1435_p1, %p88_p2 }
  0x18   : > { %p1577_p6 = por %p94_p5, %p93_p3  ;;  %s295_s19 = ssub.s32 %s1462_s12, %s1930_s16 }
  0x19   : > { %p296_p7 = scmp.eq.s32.totalorder %s295_s19, 0  ;;  %s298_s20 = sadd.s32 1, %s1446_s9 }
  0x1a   : > { %s1895_s18 = scalar_select %p1577_p6, 1, 0 }
  0x1b   : > { %s1585_s21 = scalar_select %p296_p7, %s1446_s9, %s298_s20  }
  0x1c   : > { %p308_p8 = scmp.ne.s32.totalorder %s1446_s9, %s1442_s30  ;;  %p309_p9 = scmp.eq.s32.totalorder %s1563_s14, 1 }
  0x1d   : > { %1896 = sst [smem:[#allocation26_spill]] %s1585_s21  ;;  %p314_p10 = scmp.ne.s32.totalorder %s1442_s30, %s1438_s29 }
  0x1e   : > { %p315_p11 = scmp.eq.s32.totalorder %s978_s15, 1  ;;  %p1592_p12 = por %p309_p9, %p308_p8 }
  0x1f   : > { %p1059_p1 = scmp.lt.s32.totalorder %s1466_s13, 2  ;;  %s1609_s25 = sand.u32 1, %s1466_s13  }
  0x20   : > { %s1897_s22 = scalar_select %p1592_p12, 1, 0 }
  0x21   : > { %p1597_p0 = por %p315_p11, %p314_p10  ;;  %p1604_p2 = pnand %p1059_p1, %p1572_p4 }
  0x22   : > { %s1468_s26 = smov [#allocation7]   ;;  %s1900_s2 = sld [smem:[#allocation27_spill]] }
  0x23   : > { %s1898_s23 = scalar_select %p1597_p0, 1, 0 }
  0x24   : > { %s1899_s24 = scalar_select %p1604_p2, 1, 0 }
  0x25   : > { %s373_s27 = sshll.u32 %s1468_s26, 4  ;;  %p1621_p5 = pneg %p1604_p2  ;;  %s374_s27 = int_to_ptr.vmem [resolvable:$true] %s373_s27 }
  0x28   : > { %s1141_s19 = scalar_lea.hbm %s1900_s2, 128 }
  0x29   : > { %p1142_p4 = scmp.ne.s32.totalorder %s1900_s2, %s1141_s19  ;;  %p1148_p9 = scmp.lt.u32.totalorder %s1141_s19, %s1141_s19 }
  0x2a   : > { %p1150_p10 = scmp.lt.u32.totalorder %s1141_s19, %s1900_s2 }
  0x2b   : > { %p1144_p7 = pnand %p1621_p5, %p1142_p4 }
  0x2c   : > { %p1151_p11 = por %p1150_p10, %p1148_p9 }
  0x2d   : > { %p1145_p8 = pneg %p1144_p7 }
  0x2f   : > { %p1152_p1 = pnand %p1151_p11, %p1145_p8 }
  0x31   : > { %1155 = shalt.err (!%p1152_p1)
}
  0x32   : > { %s1156_s10 = scalar_lea.vmem %s374_s27, 128  ;;  %s1163_s16 = scalar_lea.vmem %s374_s27, 256 }
  0x33   : > { %p1157_p13 = scmp.ne.s32.totalorder %s374_s27, %s1156_s10  ;;  %p1164_p12 = scmp.lt.s32.totalorder %s374_s27, %s374_s27 }
  0x34   : > { %p1165_p6 = scmp.lt.s32.totalorder %s1163_s16, %s1156_s10 }
  0x35   : > { %p1159_p3 = pnand %p1157_p13, %p1621_p5 }
  0x36   : > { %p1166_p2 = por %p1165_p6, %p1164_p12 }
  0x37   : > { %p1160_p0 = pneg %p1159_p3 }
  0x39   : > { %p1167_p4 = pnand %p1166_p2, %p1160_p0 }
  0x3b   : > { %1170 = shalt.err (!%p1167_p4)
}
  0x3c   : > { %p1902_p7 = scmp.ne.s32.totalorder %s1899_s24, 0  ;;  %s1903_s28 = scalar_lea.sflag [#allocation8], %s1609_s25 }
  0x3d   : > { %p483_p13 = scmp.lt.s32.totalorder %s1466_s13, 3  ;;  %p1904_p3 = scmp.ge.s32.totalorder %s1466_s13, 1 }
  0x3e   : > { %1039 = dma.hbm_to_vmem [thread:$0]  (!%p1902_p7), %s1900_s2, 128, %s374_s27, %s1903_s28  }
  0x3f   : > { %p1642_p8 = pnand %p1904_p3, %p483_p13  ;;  %s1469_s26 = smov [#allocation10]  }
  0x40   : > { %s415_s10 = sshll.u32 %s1469_s26, 4  ;;  %s1886_s16 = scalar_lea.sflag [#allocation11], %s1609_s25  ;;  %s416_s10 = int_to_ptr.vmem [resolvable:$true] %s415_s10 }
  0x41   : > { %s1905_s20 = scalar_select %p1642_p8, 1, 0 }
  0x42   : > { %s1906_s4 = sld [smem:[#allocation28_spill]] }
  0x48   : > { %s1171_s9 = scalar_lea.hbm %s1906_s4, 128 }
  0x49   : > { %p1172_p6 = scmp.ne.s32.totalorder %s1906_s4, %s1171_s9  ;;  %p1178_p2 = scmp.lt.u32.totalorder %s1171_s9, %s1171_s9 }
  0x4a   : > { %p1180_p9 = scmp.lt.u32.totalorder %s1171_s9, %s1906_s4 }
  0x4b   : > { %p1174_p12 = pnand %p1172_p6, %p1621_p5 }
  0x4c   : > { %p1181_p10 = por %p1180_p9, %p1178_p2 }
  0x4d   : > { %p1175_p0 = pneg %p1174_p12 }
  0x4f   : > { %p1182_p11 = pnand %p1181_p10, %p1175_p0 }
  0x51   : > { %1185 = shalt.err (!%p1182_p11)
}
  0x52   : > { %s1186_s26 = scalar_lea.vmem %s416_s10, 128  ;;  %s1193_s12 = scalar_lea.vmem %s416_s10, 256 }
  0x53   : > { %p1187_p1 = scmp.ne.s32.totalorder %s416_s10, %s1186_s26  ;;  %p1194_p3 = scmp.lt.s32.totalorder %s416_s10, %s416_s10 }
  0x54   : > { %p1195_p8 = scmp.lt.s32.totalorder %s1193_s12, %s1186_s26 }
  0x55   : > { %p1189_p4 = pnand %p1187_p1, %p1621_p5 }
  0x56   : > { %p1196_p7 = por %p1195_p8, %p1194_p3 }
  0x57   : > { %p1190_p13 = pneg %p1189_p4 }
  0x59   : > { %p1197_p6 = pnand %p1196_p7, %p1190_p13 }
  0x5b   : > { %1200 = shalt.err (!%p1197_p6)
}
  0x5c   : > { %p1907_p12 = scmp.ne.s32.totalorder %s1899_s24, 0  ;;  %s1470_s15 = smov [#allocation13]  }
  0x5d   : > { %s457_s19 = sshll.u32 %s1470_s15, 4  ;;  %s1887_s27 = scalar_lea.sflag [#allocation14], %s1609_s25  ;;  %s458_s19 = int_to_ptr.vmem [resolvable:$true] %s457_s19 }
  0x5e   : > { %1045 = dma.hbm_to_vmem [thread:$0]  (!%p1907_p12), %s1906_s4, 128, %s416_s10, %s1886_s16  }
  0x5f   : > { %s1201_s26 = scalar_lea.hbm %s1874_s6, 128 }
  0x60   : > { %p1202_p7 = scmp.ne.s32.totalorder %s1874_s6, %s1201_s26  ;;  %p1208_p2 = scmp.lt.u32.totalorder %s1201_s26, %s1201_s26 }
  0x61   : > { %p1210_p9 = scmp.lt.u32.totalorder %s1201_s26, %s1874_s6 }
  0x62   : > { %p1204_p8 = pnand %p1202_p7, %p1621_p5 }
  0x63   : > { %p1211_p10 = por %p1210_p9, %p1208_p2 }
  0x64   : > { %p1205_p0 = pneg %p1204_p8 }
  0x66   : > { %p1212_p11 = pnand %p1211_p10, %p1205_p0 }
  0x68   : > { %1215 = shalt.err (!%p1212_p11)
}
  0x69   : > { %s1216_s10 = scalar_lea.vmem %s458_s19, 128  ;;  %s1223_s2 = scalar_lea.vmem %s458_s19, 256 }
  0x6a   : > { %p1217_p1 = scmp.ne.s32.totalorder %s458_s19, %s1216_s10  ;;  %p1224_p3 = scmp.lt.s32.totalorder %s458_s19, %s458_s19 }
  0x6b   : > { %p1225_p6 = scmp.lt.s32.totalorder %s1223_s2, %s1216_s10 }
  0x6c   : > { %p1219_p4 = pnand %p1217_p1, %p1621_p5 }
  0x6d   : > { %p1226_p12 = por %p1225_p6, %p1224_p3 }
  0x6e   : > { %p1220_p13 = pneg %p1219_p4 }
  0x70   : > { %p1227_p7 = pnand %p1226_p12, %p1220_p13 }
  0x72   : > { %1230 = shalt.err (!%p1227_p7)
}
  0x73   : > { %p1908_p8 = scmp.ne.s32.totalorder %s1899_s24, 0  ;;  %s1471_s28 = smov [#allocation4]  }
  0x74   : > { %s352_s26 = sshll.u32 %s1471_s28, 4  ;;  %s1231_s21 = scalar_lea.hbm %s1869_s1, 128  ;;  %s353_s26 = int_to_ptr.vmem [resolvable:$true] %s352_s26 }
  0x75   : > { %1051 = dma.hbm_to_vmem [thread:$0]  (!%p1908_p8), %s1874_s6, 128, %s458_s19, %s1887_s27  }
  0x76   : > { %p1232_p12 = scmp.ne.s32.totalorder %s1869_s1, %s1231_s21  ;;  %p1238_p9 = scmp.lt.u32.totalorder %s1231_s21, %s1231_s21 }
  0x77   : > { %p1240_p10 = scmp.lt.u32.totalorder %s1231_s21, %s1869_s1 }
  0x78   : > { %p1234_p0 = pnand %p1232_p12, %p1621_p5 }
  0x79   : > { %p1241_p11 = por %p1240_p10, %p1238_p9 }
  0x7a   : > { %p1235_p2 = pneg %p1234_p0 }
  0x7c   : > { %p1242_p1 = pnand %p1241_p11, %p1235_p2 }
  0x7e   : > { %1245 = shalt.err (!%p1242_p1)
}
  0x7f   : > { %s1246_s19 = scalar_lea.vmem %s353_s26, 128  ;;  %s1253_s13 = scalar_lea.vmem %s353_s26, 256 }
  0x80   : > { %p1247_p4 = scmp.ne.s32.totalorder %s353_s26, %s1246_s19  ;;  %p1254_p6 = scmp.lt.s32.totalorder %s353_s26, %s353_s26 }
  0x81   : > { %p1255_p7 = scmp.lt.s32.totalorder %s1253_s13, %s1246_s19 }
  0x82   : > { %p1249_p13 = pnand %p1247_p4, %p1621_p5 }
  0x83   : > { %p1256_p8 = por %p1255_p7, %p1254_p6 }
  0x84   : > { %p1250_p3 = pneg %p1249_p13 }
  0x86   : > { %p1257_p12 = pnand %p1256_p8, %p1250_p3 }
  0x88   : > { %1260 = shalt.err (!%p1257_p12)
}
  0x89   : > { %p1909_p0 = scmp.ne.s32.totalorder %s1899_s24, 0  ;;  %s1472_s16 = smov [#allocation9]  }
  0x8a   : > { %s394_s28 = sshll.u32 %s1472_s16, 4  ;;  %s1261_s21 = scalar_lea.hbm %s1871_s3, 128  ;;  %s395_s28 = int_to_ptr.vmem [resolvable:$true] %s394_s28 }
  0x8b   : > { %1036 = dma.hbm_to_vmem [thread:$0]  (!%p1909_p0), %s1869_s1, 128, %s353_s26, [#allocation5]  }
  0x8c   : > { %p1262_p2 = scmp.ne.s32.totalorder %s1871_s3, %s1261_s21  ;;  %p1268_p10 = scmp.lt.u32.totalorder %s1261_s21, %s1261_s21 }
  0x8d   : > { %p1270_p11 = scmp.lt.u32.totalorder %s1261_s21, %s1871_s3 }
  0x8e   : > { %p1264_p8 = pnand %p1262_p2, %p1621_p5 }
  0x8f   : > { %p1271_p1 = por %p1270_p11, %p1268_p10 }
  0x90   : > { %p1265_p9 = pneg %p1264_p8 }
  0x92   : > { %p1272_p4 = pnand %p1271_p1, %p1265_p9 }
  0x94   : > { %1275 = shalt.err (!%p1272_p4)
}
  0x95   : > { %s1276_s26 = scalar_lea.vmem %s395_s28, 128  ;;  %s1283_s15 = scalar_lea.vmem %s395_s28, 256 }
  0x96   : > { %p1277_p13 = scmp.ne.s32.totalorder %s395_s28, %s1276_s26  ;;  %p1284_p7 = scmp.lt.s32.totalorder %s395_s28, %s395_s28 }
  0x97   : > { %p1285_p12 = scmp.lt.s32.totalorder %s1283_s15, %s1276_s26 }
  0x98   : > { %p1279_p3 = pnand %p1277_p13, %p1621_p5 }
  0x99   : > { %p1286_p0 = por %p1285_p12, %p1284_p7 }
  0x9a   : > { %p1280_p6 = pneg %p1279_p3 }
  0x9c   : > { %p1287_p2 = pnand %p1286_p0, %p1280_p6 }
  0x9e   : > { %1290 = shalt.err (!%p1287_p2)
}
  0x9f   : > { %p1910_p8 = scmp.ne.s32.totalorder %s1899_s24, 0  ;;  %s1911_s4 = scalar_lea.sflag [#allocation8], %s1609_s25 }
  0xa0   : > { %s1473_s9 = smov [#allocation12]   ;;  %s1291_s19 = scalar_lea.hbm %s1873_s5, 128 }
  0xa1   : > { %1042 = dma.hbm_to_vmem [thread:$0]  (!%p1910_p8), %s1871_s3, 128, %s395_s28, %s1911_s4  }
  0xa2   : > { %s436_s21 = sshll.u32 %s1473_s9, 4  ;;  %p1292_p0 = scmp.ne.s32.totalorder %s1873_s5, %s1291_s19  ;;  %s437_s21 = int_to_ptr.vmem [resolvable:$true] %s436_s21 }
  0xa3   : > { %p1298_p11 = scmp.lt.u32.totalorder %s1291_s19, %s1291_s19  ;;  %p1300_p1 = scmp.lt.u32.totalorder %s1291_s19, %s1873_s5 }
  0xa4   : > { %p1294_p9 = pnand %p1292_p0, %p1621_p5 }
  0xa5   : > { %p1301_p4 = por %p1300_p1, %p1298_p11 }
  0xa6   : > { %p1295_p10 = pneg %p1294_p9 }
  0xa8   : > { %p1302_p13 = pnand %p1301_p4, %p1295_p10 }
  0xaa   : > { %1305 = shalt.err (!%p1302_p13)
}
  0xab   : > { %s1306_s28 = scalar_lea.vmem %s437_s21, 128  ;;  %s1313_s4 = scalar_lea.vmem %s437_s21, 256 }
  0xac   : > { %p1307_p3 = scmp.ne.s32.totalorder %s437_s21, %s1306_s28  ;;  %p1314_p12 = scmp.lt.s32.totalorder %s437_s21, %s437_s21 }
  0xad   : > { %p1315_p2 = scmp.lt.s32.totalorder %s1313_s4, %s1306_s28 }
  0xae   : > { %p1309_p6 = pnand %p1307_p3, %p1621_p5 }
  0xaf   : > { %p1316_p8 = por %p1315_p2, %p1314_p12 }
  0xb0   : > { %p1310_p7 = pneg %p1309_p6 }
  0xb2   : > { %p1317_p0 = pnand %p1316_p8, %p1310_p7 }
  0xb4   : > { %1320 = shalt.err (!%p1317_p0)
}
  0xb5   : > { %p1912_p9 = scmp.ne.s32.totalorder %s1899_s24, 0  ;;  %s1913_s27 = scalar_lea.sflag [#allocation11], %s1609_s25 }
  0xb6   : > { %s1474_s9 = smov [#allocation15]   ;;  %s1321_s13 = scalar_lea.hbm %s1875_s7, 128 }
  0xb7   : > { %1048 = dma.hbm_to_vmem [thread:$0]  (!%p1912_p9), %s1873_s5, 128, %s437_s21, %s1913_s27  }
  0xb8   : > { %s478_s10 = sshll.u32 %s1474_s9, 4  ;;  %p1322_p8 = scmp.ne.s32.totalorder %s1875_s7, %s1321_s13  ;;  %s479_s10 = int_to_ptr.vmem [resolvable:$true] %s478_s10 }
  0xb9   : > { %p1328_p1 = scmp.lt.u32.totalorder %s1321_s13, %s1321_s13  ;;  %p1330_p4 = scmp.lt.u32.totalorder %s1321_s13, %s1875_s7 }
  0xba   : > { %p1324_p10 = pnand %p1322_p8, %p1621_p5 }
  0xbb   : > { %p1331_p13 = por %p1330_p4, %p1328_p1 }
  0xbc   : > { %p1325_p11 = pneg %p1324_p10 }
  0xbe   : > { %p1332_p3 = pnand %p1331_p13, %p1325_p11 }
  0xc0   : > { %1335 = shalt.err (!%p1332_p3)
}
  0xc1   : > { %s1336_s21 = scalar_lea.vmem %s479_s10, 128  ;;  %s1343_s27 = scalar_lea.vmem %s479_s10, 256 }
  0xc2   : > { %p1337_p6 = scmp.ne.s32.totalorder %s479_s10, %s1336_s21  ;;  %p1344_p2 = scmp.lt.s32.totalorder %s479_s10, %s479_s10 }
  0xc3   : > { %p1345_p0 = scmp.lt.s32.totalorder %s1343_s27, %s1336_s21 }
  0xc4   : > { %p1339_p7 = pnand %p1337_p6, %p1621_p5 }
  0xc5   : > { %p1346_p9 = por %p1345_p0, %p1344_p2 }
  0xc6   : > { %p1340_p12 = pneg %p1339_p7 }
  0xc8   : > { %p1347_p8 = pnand %p1346_p9, %p1340_p12 }
  0xca   : > { %1350 = shalt.err (!%p1347_p8)
}
  0xcb   : > { %p1914_p10 = scmp.ne.s32.totalorder %s1899_s24, 0  ;;  %s1915_s16 = scalar_lea.sflag [#allocation14], %s1609_s25 }
  0xcc   : > { %p1916_p11 = scmp.ne.s32.totalorder %s1905_s20, 0 }
  0xcd   : > { %1054 = dma.hbm_to_vmem [thread:$0]  (!%p1914_p10), %s1875_s7, 128, %s479_s10, %s1915_s16  }
  0xce   : > { %487 = sbr.rel (%p1916_p11) target bundleno = 920 (0x398), region = 52  ;;  %s489_s17 = sand.u32 (!%p1916_p11), 1, %s1454_s11  }
  0xcf   : > { %s1769_s2 = sshll.u32 (!%p1916_p11), %s489_s17, 3  ;;  %s490_s19 = scalar_lea.sflag (!%p1916_p11), [#allocation5], %s489_s17 }
  0xd0   : > { %s493_s13 = scalar_lea.vmem (!%p1916_p11), [#allocation4], %s1769_s2  ;;  %p1917_p5 = scmp.ne.s32.totalorder (!%p1916_p11), %s1895_s18, 0 }
  0xd5   : > { %1416 = dma.done.wait (%p1917_p5), %s490_s19, 128  }
  0xd6   : > { %1418 = vsyncadd (%p1917_p5), %s490_s19, 4294967168  ;;  %s498_s24 = sand.u32 1, %s1563_s14   ;;  %s502_s20 = scalar_lea.vmem [#allocation7], %s1769_s2 }
  0xd7   : > { %s499_s25 = scalar_lea.sflag [#allocation8], %s498_s24 }
  0xd8   : > { %1420 = dma.done.wait (%p1917_p5), %s499_s25, 256  }
  0xd9   : > { %1422 = vsyncadd (%p1917_p5), %s499_s25, 4294967040  ;;  %s511_s10 = scalar_lea.vmem [#allocation9], %s1769_s2  ;;  %s517_s26 = scalar_lea.sflag [#allocation11], %s498_s24 }
  0xda   : > { %s520_s15 = scalar_lea.vmem [#allocation10], %s1769_s2 }
  0xdb   : > { %1424 = dma.done.wait (%p1917_p5), %s517_s26, 256  }
  0xdc   : > { %1426 = vsyncadd (%p1917_p5), %s517_s26, 4294967040  ;;  %s529_s14 = scalar_lea.vmem [#allocation12], %s1769_s2  ;;  %s535_s28 = scalar_lea.sflag [#allocation14], %s498_s24 }
  0xdd   : > { %s538_s4 = scalar_lea.vmem [#allocation13], %s1769_s2 }
  0xde   : > { %1428 = dma.done.wait (%p1917_p5), %s535_s28, 256  }
  0xdf   : > { %1430 = vsyncadd (%p1917_p5), %s535_s28, 4294967040  ;;  %vm682_vm0 = vcmask 64512   ;;  %v680_v0 = vld [vmem:[%s520_s15] sm:$0xff]  ;;  %v646_v14 = vld [vmem:[%s493_s13] sm:$0xff]  ;;  %vm651_vm1 = vcmask 261120   ;;  %s655_s18 = sld [smem:[#allocation3]]  ;;  %v641_v21 = vlaneseq }
  0xe0   : > { %v711_v1 = vld [vmem:[%s538_s4] sm:$0xff]  ;;  %v683_v2 = vsel %vm682_vm0, %v680_v0, -inf  ;;  %s1004_s21 = sshll.u32 %s1458_s0, 3  ;;  %v648_v25 = vld [vmem:[%s511_s10] sm:$0xff]  ;;  %s547_s27 = scalar_lea.vmem [#allocation15], %s1769_s2  ;;  %vm665_vm3 = vcmask 7168  }
  0xe1   : > { %684 = vmax.xlane.f32.xlu0 %v683_v2  ;;  %v713_v3 = vsel %vm682_vm0, %v711_v1, -inf  ;;  %v647_v15 = vld [vmem:[%s502_s20] sm:$0xff]  ;;  %v642_v27 = vshrl.u32 %v641_v21, 7  ;;  %v681_v29 = vld [vmem:[%s529_s14] sm:$0xff]  ;;  %v643_v30 = vstv %s1004_s21  ;;  %v660_v34 = vsub.f32 1.0, %v648_v25  ;;  %s607_s16 = sand.u32 1, %s1442_s30  }
  0xe2   : > { %v649_v16 = vsub.f32 %v646_v14, %v647_v15  ;;  %v712_v39 = vld [vmem:[%s547_s27] sm:$0xff]  ;;  %s1003_s17 = sshll.u32 %s607_s16, 3  ;;  %s1008_s25 = sshll.u32 %s1458_s0, 7 }
  0xe3   : > { %v644_v38 = vadd.s32 %v643_v30, %v642_v27  ;;  %s609_s10 = scalar_lea.vmem [#allocation16], %s1003_s17  ;;  %s1815_s4 = scalar_lea.hbm %s1876_s8, %s1008_s25 }
  0xe4   : > { %v650_v17 = vmul.f32 %v649_v16, %v649_v16  ;;  %s770_s26 = sshll.u32 %s609_s10, 4  ;;  %p1918_p1 = scmp.ne.s32.totalorder %s1897_s22, 0  ;;  %s1817_s26 = int_to_ptr.vmem [resolvable:$true] %s770_s26 }
  0xe5   : > { %714 = vmax.xlane.f32.xlu0 %v713_v3  ;;  %v656_v26 = vstv %s655_s18  ;;  %vm645_vm2 = vcmp.lt.s32.totalorder %v644_v38, 8  ;;  %s757_s18 = scalar_lea.sflag [#allocation6], %s607_s16  ;;  %s1351_s21 = scalar_lea.vmem %s1817_s26, 128 }
  0xe6   : > { %v652_v18 = vsel %vm651_vm1, %v650_v17, 0.0  ;;  %p1352_p9 = scmp.ne.s32.totalorder %s1817_s26, %s1351_s21  ;;  %s1475_s0 = smov [#allocation16]  }
  0xe7   : > { %s1355_s27 = sshll.u32 %s1475_s0, 4  ;;  %s1356_s27 = int_to_ptr.vmem [resolvable:$false] %s1355_s27 }
  0xe8   : > { %p1353_p4 = pnand %p1352_p9, %p1918_p1  ;;  %p1358_p3 = scmp.lt.s32.totalorder %s1817_s26, %s1356_s27 }
  0xe9   : > { %653 = vadd.xlane.f32.xlu0 %v652_v18 }
  0xea   : > { %p1354_p13 = pneg %p1353_p4 }
 0x16e   : > { %v685_v4 = vpop.xlane.xlu0 %684 }
 0x16f   : > { %v686_v5 = vsub.f32 %v680_v0, %v685_v4 }
 0x171   : > { %v687_v6 = vmul.f32 1.442695, %v686_v5 }
 0x172   : > { %v715_v7 = vpop.xlane.xlu0 %714 }
 0x173   : > { %1133 = vpow2.f32 %v687_v6  ;;  %v716_v8 = vsub.f32 %v711_v1, %v715_v7 }
 0x175   : > { %v717_v9 = vmul.f32 1.442695, %v716_v8 }
 0x176   : > { %v654_v33 = vpop.xlane.xlu0 %653 }
 0x177   : > { %1135 = vpow2.f32 %v717_v9  ;;  %v657_v35 = vsub.f32 %v656_v26, %v654_v33  ;;  %v659_v41 = vmul.f32 %v654_v33, %v648_v25 }
 0x179   : > { %v658_v40 = vmax.f32 %v657_v35, 0.0 }
 0x17b   : > { %v661_v44 = vmul.f32 %v660_v34, %v658_v40 }
 0x17d   : > { %v1134_v10 = vpop.eup %1133  ;;  %v662_v46 = vadd.f32 %v661_v44, %v659_v41 }
 0x17e   : > { %v689_v11 = vsel %vm682_vm0, %v1134_v10, 0.0 }
 0x17f   : > { %690 = vadd.xlane.f32.xlu1 %v689_v11  ;;  %v664_v48 = vsel %vm645_vm2, %v662_v46, 0.0 }
 0x180   : > { %v666_v49 = vsel %vm665_vm3, %v664_v48, 0.0 }
 0x181   : > { %v1136_v12 = vpop.eup %1135 }
 0x182   : > { %v719_v13 = vsel %vm682_vm0, %v1136_v12, 0.0 }
 0x183   : > { %720 = vadd.xlane.f32.xlu1 %v719_v13 }
 0x20c   : > { %v691_v19 = vpop.xlane.xlu1 %690 }
 0x20d   : > { %1137 = vlog2.f32 %v691_v19 }
 0x210   : > { %v721_v20 = vpop.xlane.xlu1 %720 }
 0x211   : > { %1139 = vlog2.f32 %v721_v20 }
 0x217   : > { %v1138_v22 = vpop.eup %1137 }
 0x218   : > { %v693_v23 = vmul.f32 0.6931472, %v1138_v22 }
 0x21a   : > { %v694_v24 = vadd.f32 %v693_v23, %v685_v4 }
 0x21b   : > { %v1140_v28 = vpop.eup %1139 }
 0x21c   : > { %v723_v31 = vmul.f32 0.6931472, %v1140_v28  ;;  %v695_v32 = vsub.f32 %v694_v24, %v680_v0 }
 0x21e   : > { %v724_v36 = vadd.f32 %v723_v31, %v715_v7  ;;  %v696_v37 = vmul.f32 %v695_v32, %v681_v29 }
 0x220   : > { %v697_v42 = vsel %vm682_vm0, %v696_v37, 0.0  ;;  %v725_v43 = vsub.f32 %v724_v36, %v711_v1 }
 0x221   : > { %698 = vadd.xlane.f32.xlu1 %v697_v42 }
 0x222   : > { %v726_v45 = vmul.f32 %v725_v43, %v712_v39 }
 0x224   : > { %v727_v47 = vsel %vm682_vm0, %v726_v45, 0.0 }
 0x225   : > { %728 = vadd.xlane.f32.xlu0 %v727_v47  ;;  %667 = vadd.xlane.f32.xlu1 %v666_v49 }
 0x2ae   : > { %v699_v50 = vpop.xlane.xlu1 %698 }
 0x2af   : > { %v700_v51 = vsel %vm645_vm2, %v699_v50, 0.0 }
 0x2b0   : > { %v701_v52 = vsel %vm665_vm3, %v700_v51, 0.0 }
 0x2b1   : > { %702 = vadd.xlane.f32.xlu0 %v701_v52 }
 0x2b2   : > { %v729_v53 = vpop.xlane.xlu0 %728  ;;  %v668_v56 = vpop.xlane.xlu1 %667 }
 0x2b3   : > { %v730_v54 = vsel %vm645_vm2, %v729_v53, 0.0  ;;  %v669_v57 = vrot.slane %v668_v56, 4 }
 0x2b4   : > { %v731_v55 = vsel %vm665_vm3, %v730_v54, 0.0 }
 0x2b5   : > { %732 = vadd.xlane.f32.xlu1 %v731_v55  ;;  %v670_v58 = vadd.f32 %v669_v57, %v668_v56 }
 0x2b7   : > { %v671_v59 = vrot.slane %v670_v58, 2 }
 0x2b9   : > { %v672_v60 = vadd.f32 %v671_v59, %v670_v58 }
 0x2bb   : > { %v673_v61 = vrot.slane %v672_v60, 1 }
 0x2bd   : > { %v674_v62 = vadd.f32 %v673_v61, %v672_v60 }
 0x2bf   : > { %1011 = vpush %v674_v62 }
 0x2f0   : > { %s1012_s12 = spop %1011 }
 0x2f1   : > { %s749_s13 = smul.f32 0.7, %s1012_s12  ;;  %s1357_s12 = scalar_lea.vmem %s1356_s27, 256 }
 0x2f2   : > { %p1359_p6 = scmp.lt.s32.totalorder %s1357_s12, %s1351_s21 }
 0x2f4   : > { %p1360_p7 = por %p1359_p6, %p1358_p3 }
 0x2f6   : > { %p1361_p12 = pnand %p1360_p7, %p1354_p13 }
 0x33e   : > { %v703_v63 = vpop.xlane.xlu0 %702 }
 0x33f   : > { %v704_v0 = vrot.slane %v703_v63, 4 }
 0x341   : > { %v705_v1 = vadd.f32 %v704_v0, %v703_v63 }
 0x342   : > { %v733_v2 = vpop.xlane.xlu1 %732 }
 0x343   : > { %v706_v3 = vrot.slane %v705_v1, 2  ;;  %v734_v4 = vrot.slane %v733_v2, 4 }
 0x345   : > { %v707_v5 = vadd.f32 %v706_v3, %v705_v1  ;;  %v735_v6 = vadd.f32 %v734_v4, %v733_v2 }
 0x347   : > { %v736_v7 = vrot.slane %v735_v6, 2  ;;  %v708_v8 = vrot.slane %v707_v5, 1 }
 0x349   : > { %v737_v9 = vadd.f32 %v736_v7, %v735_v6  ;;  %v709_v10 = vadd.f32 %v708_v8, %v707_v5 }
 0x34b   : > { %1013 = vpush %v709_v10  ;;  %v738_v11 = vrot.slane %v737_v9, 1 }
 0x34d   : > { %v739_v12 = vadd.f32 %v738_v11, %v737_v9 }
 0x34f   : > { %1015 = vpush %v739_v12 }
 0x37c   : > { %s1014_s9 = spop %1013 }
 0x380   : > { %s1016_s2 = spop %1015 }
 0x381   : > { %s741_s19 = sadd.f32 %s1016_s2, %s1014_s9 }
 0x383   : > { %s751_s24 = smul.f32 0.15, %s741_s19 }
 0x385   : > { %s752_s20 = sadd.f32 %s751_s24, %s749_s13 }
 0x387   : > { %s753_s15 = smul.f32 0.125, %s752_s20 }
 0x389   : > { %v754_v13 = vstv %s753_s15 }
 0x38a   : > { %755 = vst [vmem:[%s609_s10] sm:$0xff] %v754_v13 }
 0x38b   : > { %1364 = shalt.err (!%p1361_p12)
}
 0x38c   : > { %s1365_s16 = scalar_lea.hbm %s1815_s4, 128  ;;  %s1369_s2 = scalar_lea.hbm %s1876_s8, 256 }
 0x38d   : > { %p1366_p2 = scmp.ne.s32.totalorder %s1815_s4, %s1365_s16  ;;  %p1370_p10 = scmp.lt.u32.totalorder %s1815_s4, %s1876_s8 }
 0x38e   : > { %p1371_p11 = scmp.lt.u32.totalorder %s1369_s2, %s1365_s16  ;;  %p1373_p9 = scmp.lt.u32.totalorder %s1365_s16, %s1815_s4 }
 0x38f   : > { %p1367_p0 = pnand %p1366_p2, %p1918_p1 }
 0x390   : > { %p1372_p5 = por %p1371_p11, %p1370_p10 }
 0x391   : > { %p1368_p8 = pneg %p1367_p0 }
 0x392   : > { %p1374_p4 = por %p1373_p9, %p1372_p5 }
 0x394   : > { %p1375_p13 = pnand %p1374_p4, %p1368_p8 }
 0x396   : > { %1378 = shalt.err (!%p1375_p13)
}
 0x397   : > { %1031 = dma.vmem_to_hbm [thread:$0]  (%p1918_p1), %s1817_s26, 128, %s1815_s4, %s757_s18  }
 0x398 PF: > { %s1919_s24 = sld [smem:[#allocation24_spill]]  ;;  %s782_s25 = sand.u32 1, %s1438_s29  }
 0x399   : > { %p1920_p3 = scmp.ne.s32.totalorder %s1898_s23, 0  ;;  %s783_s20 = scalar_lea.sflag [#allocation6], %s782_s25 }
 0x39e   : > { %p1921_p6 = scmp.ge.s32.totalorder %s1919_s24, 2 }
 0x3a0   : > { %p1056_p7 = pnand %p1921_p6, %p1920_p3 }
 0x3a2   : > { %1432 = dma.done.wait (!%p1056_p7), %s783_s20, 128  }
 0x3a3   : > { %1434 = vsyncadd (!%p1056_p7), %s783_s20, 4294967168  ;;  %s34_s13 = sadd.s32 1, %s1919_s24   ;;  %s1922_s10 = sld [smem:[#allocation22_spill]] }
 0x3a4   : > { %p31_p12 = scmp.ge.s32.totalorder %s34_s13, 4   ;;  %s1923_s9 = sld [smem:[#allocation26_spill]] }
 0x3a5   : > { %s1924_s0 = sld [smem:[#allocation23_spill]]  ;;  %s1925_s12 = sld [smem:[#allocation25_spill]] }
 0x3a6   : > { %s1926_s29 = smov %s1442_s30  ;;  %33 = sbr.rel (!%p31_p12) target bundleno = 17 (0x11), region = 181 }
 0x3a9   : > { %s1927_s30 = smov %s1922_s10  ;;  %s1928_s10 = smov %s1454_s11 }
 0x3aa   : > { %s1858_s11 = smov 0  }
 0x3ad   :  { %788 = vsyncpa [#allocation5], 1 }
 0x3ae   :  { %790 = vsyncpa [#allocation5 + $0x1], 1 }
 0x3af   :  { %791 = vsyncpa [#allocation8], 1 }
 0x3b0   :  { %793 = vsyncpa [#allocation8 + $0x1], 1 }
 0x3b1   :  { %794 = vsyncpa [#allocation11], 1 }
 0x3b2   :  { %796 = vsyncpa [#allocation11 + $0x1], 1 }
 0x3b3   :  { %797 = vsyncpa [#allocation14], 1 }
 0x3b4   :  { %799 = vsyncpa [#allocation14 + $0x1], 1 }
 0x3b5   :  { %800 = vsyncpa [#allocation6], 1 }
 0x3b6   :  { %802 = vsyncpa [#allocation6 + $0x1], 1 }

</bundles_post_ra>
